<compile_context>
chip_gen: v6e
topology: v6e:2x2x1
jax: 0.10.0
libtpu: 0.0.40
codegen_flags: <defaults>
</compile_context>

<pallas_src>
import jax
import jax.numpy as jnp
from jax.experimental import pallas as pl
from jax.experimental.pallas import tpu as pltpu


def _round_up(n, m):
    return ((n + m - 1) // m) * m


def fusion_mlp_kernel(x_ref, w1_ref, b1_ref, w2_ref, alpha_ref, b2_ref, o_ref):
    # Linear(in_dim, H) with eval-mode BatchNorm1d folded into w1'/b1'.
    # x arrives as f32, cast to bf16 on-chip (VPU work hidden under the DMA);
    # MXU accumulates in f32.
    x = x_ref[...].astype(jnp.bfloat16)
    h = jnp.dot(x, w1_ref[...], preferred_element_type=jnp.float32)
    h = h + b1_ref[...]

    # PReLU (single shared alpha, PyTorch default num_parameters=1), scalar from SMEM.
    alpha = alpha_ref[0]
    h = jnp.where(h >= 0.0, h, alpha * h)

    # Dropout(0.3): identity in eval mode.
    # TODO(synk): training-mode dropout (random mask + 1/(1-p) scaling) not implemented.

    # Linear(H, 1): 1-wide GEMM replaced by VPU multiply + XLU lane reduction.
    logits = jnp.sum(h * w2_ref[...], axis=-1, keepdims=True) + b2_ref[0]

    # Sigmoid: exp on EUP, approximate reciprocal on EUP (keeps the epilogue off the VALU).
    o_ref[...] = pl.reciprocal(1.0 + jnp.exp(-logits), approx=True)


def prepare_params(w1, b1, gamma, beta, running_mean, running_var, eps,
                   alpha, w2, b2, *, lane=128):
    """One-time (model-load) parameter prep:
       - fold BatchNorm1d eval affine into Linear-1 weight/bias,
       - zero-pad hidden dim to a multiple of 128,
       - pre-transpose w2 to a (1, Hp) row,
       - cast w1 to bf16 for the MXU fast path,
       - pack alpha / b2 as (1,) SMEM scalars."""
    H = w1.shape[1]
    scale = gamma / jnp.sqrt(running_var + eps)      # (1, H)
    shift = beta - running_mean * scale              # (1, H)
    w1f = w1 * scale                                 # (in_dim, H)
    b1f = b1 * scale + shift                         # (1, H)
    w2row = w2.reshape(1, H)                         # (1, H)  (== w2.T)

    Hp = _round_up(H, lane)
    pad = Hp - H
    if pad:
        w1f = jnp.pad(w1f, ((0, 0), (0, pad)))
        b1f = jnp.pad(b1f, ((0, 0), (0, pad)))
        w2row = jnp.pad(w2row, ((0, 0), (0, pad)))   # zero pad -> no leakage into logits

    w1f = w1f.astype(jnp.bfloat16)
    b1f = b1f.astype(jnp.float32)
    w2row = w2row.astype(jnp.float32)
    alpha_s = jnp.reshape(alpha, (1,)).astype(jnp.float32)
    b2_s = jnp.reshape(b2, (1,)).astype(jnp.float32)
    return w1f, b1f, w2row, alpha_s, b2_s


def fusion_mlp(x, w1f, b1f, w2row, alpha_s, b2_s, *, block_b=1024):
    """x: (B, in_dim) float32. Returns (B, 1) float32 sigmoid outputs."""
    B, in_dim = x.shape
    Hp = w1f.shape[1]

    # Batch tile: multiple of 16 (covers bf16 sublane packing), capped at block_b.
    BM = min(block_b, _round_up(B, 16))
    Bp = pl.cdiv(B, BM) * BM
    if Bp != B:
        x = jnp.pad(x, ((0, Bp - B), (0, 0)))

    grid = (Bp // BM,)
    out = pl.pallas_call(
        fusion_mlp_kernel,
        out_shape=jax.ShapeDtypeStruct((Bp, 1), jnp.float32),
        grid=grid,
        in_specs=[
            pl.BlockSpec((BM, in_dim), lambda i: (i, 0)),          # x: streamed over batch
            pl.BlockSpec((in_dim, Hp), lambda i: (0, 0)),          # w1': VMEM-resident
            pl.BlockSpec((1, Hp), lambda i: (0, 0)),               # folded bias
            pl.BlockSpec((1, Hp), lambda i: (0, 0)),               # w2 row
            pl.BlockSpec(memory_space=pltpu.MemorySpace.SMEM),     # alpha scalar
            pl.BlockSpec(memory_space=pltpu.MemorySpace.SMEM),     # b2 scalar
        ],
        out_specs=pl.BlockSpec((BM, 1), lambda i: (i, 0)),
        compiler_params=pltpu.CompilerParams(
            dimension_semantics=("parallel",)),
    )(x, w1f, b1f, w2row, alpha_s, b2_s)
    return out[:B]


if __name__ == "__main__":
    key = jax.random.PRNGKey(0)
    B, in_dim, H = 8, 32, 300   # n_hiddens=300 as in the module default

    ks = jax.random.split(key, 8)
    x = jax.random.normal(ks[0], (B, in_dim), jnp.float32)

    # Synthetic parameters (shapes per the module __init__); Linear weights stored
    # pre-transposed: w1 = (in_dim, H), w2 = (H, 1).
    w1 = jax.random.normal(ks[1], (in_dim, H), jnp.float32) * (1.0 / (in_dim ** 0.5))
    b1 = jax.random.normal(ks[2], (1, H), jnp.float32) * 0.01

    gamma = 1.0 + 0.1 * jax.random.normal(ks[3], (1, H), jnp.float32)
    beta = 0.1 * jax.random.normal(ks[4], (1, H), jnp.float32)
    running_mean = 0.1 * jax.random.normal(ks[5], (1, H), jnp.float32)
    running_var = 1.0 + 0.1 * jnp.abs(jax.random.normal(ks[6], (1, H), jnp.float32))
    eps = 1e-5

    alpha = jnp.full((1, 1), 0.25, jnp.float32)      # PReLU default init
    w2 = jax.random.normal(ks[7], (H, 1), jnp.float32) * (1.0 / (H ** 0.5))
    b2 = jnp.zeros((1, 1), jnp.float32)

    # One-time parameter prep (BN fold + pad + bf16 + SMEM scalars).
    w1f, b1f, w2row, alpha_s, b2_s = prepare_params(
        w1, b1, gamma, beta, running_mean, running_var, eps, alpha, w2, b2)

    out = fusion_mlp(x, w1f, b1f, w2row, alpha_s, b2_s)
    out = jax.block_until_ready(out)
    assert out.shape == (B, 1)

    # --- Reference 1: pure f32 eval-mode module semantics (loose tol: bf16 MXU path) ---
    scale = gamma / jnp.sqrt(running_var + eps)
    shift = beta - running_mean * scale
    h = x @ w1 + b1
    h = h * scale + shift
    h = jnp.where(h >= 0.0, h, 0.25 * h)
    ref_f32 = jax.nn.sigmoid(h @ w2 + b2)
    assert jnp.allclose(out, ref_f32, atol=2e-2), "mismatch vs f32 reference"

    # --- Reference 2: matched path (folded params, bf16 first matmul) tighter tol ---
    hm = jnp.dot(x.astype(jnp.bfloat16), w1f, preferred_element_type=jnp.float32) + b1f
    hm = jnp.where(hm >= 0.0, hm, alpha_s[0] * hm)
    ref_m = jax.nn.sigmoid(jnp.sum(hm * w2row, axis=-1, keepdims=True) + b2_s[0])
    assert jnp.allclose(out, ref_m, atol=5e-3), "mismatch vs matched reference"

    print("KERNEL_OK")
</pallas_src>

<mosaic_0001>
module attributes {stable_mosaic.version = 11 : i64} {
  func.func @fusion_mlp_kernel(%arg0: i32, %arg1: memref<16x32xf32, #tpu.memory_space<vmem>>, %arg2: memref<32x384xbf16, #tpu.memory_space<vmem>>, %arg3: memref<1x384xf32, #tpu.memory_space<vmem>>, %arg4: memref<1x384xf32, #tpu.memory_space<vmem>>, %arg5: memref<1xf32, #tpu.memory_space<smem>>, %arg6: memref<1xf32, #tpu.memory_space<smem>>, %arg7: memref<16x1xf32, #tpu.memory_space<vmem>>) attributes {dimension_semantics = [#tpu.dimension_semantics<parallel>], iteration_bounds = array<i64: 1>, scalar_prefetch = 0 : i64, scratch_operands = 0 : i64, tpu.core_type = #tpu.core_type<tc>, window_params = [{transform_indices = @transform_0, window_bounds = array<i64: 16, 32>}, {pipeline_mode = #tpu.pipeline_mode<synchronous>, transform_indices = @transform_1, window_bounds = array<i64: 32, 384>}, {pipeline_mode = #tpu.pipeline_mode<synchronous>, transform_indices = @transform_2, window_bounds = array<i64: 1, 384>}, {pipeline_mode = #tpu.pipeline_mode<synchronous>, transform_indices = @transform_3, window_bounds = array<i64: 1, 384>}, {transform_indices = @transform_4, window_bounds = array<i64: 1>}, {transform_indices = @transform_5, window_bounds = array<i64: 1>}, {transform_indices = @transform_6, window_bounds = array<i64: 16, 1>}]} {
    %c0 = arith.constant 0 : index
    %c0_0 = arith.constant 0 : index
    %0 = vector.load %arg1[%c0, %c0_0] : memref<16x32xf32, #tpu.memory_space<vmem>>, vector<16x32xf32>
    %1 = arith.truncf %0 : vector<16x32xf32> to vector<16x32xbf16>
    %c0_1 = arith.constant 0 : index
    %c0_2 = arith.constant 0 : index
    %2 = vector.load %arg2[%c0_1, %c0_2] : memref<32x384xbf16, #tpu.memory_space<vmem>>, vector<32x384xbf16>
    %cst = arith.constant dense<0.000000e+00> : vector<16x384xf32>
    %3 = tpu.matmul %1, %2, %cst {dimension_numbers = #tpu.dot_dimension_numbers<[1], [0], [0], [1], [0, 0, 1, 1], [], []>} : vector<16x32xbf16>, vector<32x384xbf16>, vector<16x384xf32> -> vector<16x384xf32>
    %c0_3 = arith.constant 0 : index
    %c0_4 = arith.constant 0 : index
    %4 = vector.load %arg3[%c0_3, %c0_4] : memref<1x384xf32, #tpu.memory_space<vmem>>, vector<1x384xf32>
    %5 = vector.broadcast %4 : vector<1x384xf32> to vector<16x384xf32>
    %6 = arith.addf %3, %5 : vector<16x384xf32>
    %c0_5 = arith.constant 0 : index
    %7 = memref.load %arg5[%c0_5] : memref<1xf32, #tpu.memory_space<smem>>
    %cst_6 = arith.constant 0.000000e+00 : f32
    %8 = vector.broadcast %cst_6 : f32 to vector<16x384xf32>
    %9 = arith.cmpf oge, %6, %8 : vector<16x384xf32>
    %10 = vector.broadcast %7 : f32 to vector<16x384xf32>
    %11 = arith.mulf %10, %6 : vector<16x384xf32>
    %12 = arith.select %9, %6, %11 : vector<16x384xi1>, vector<16x384xf32>
    %c0_7 = arith.constant 0 : index
    %c0_8 = arith.constant 0 : index
    %13 = vector.load %arg4[%c0_7, %c0_8] : memref<1x384xf32, #tpu.memory_space<vmem>>, vector<1x384xf32>
    %14 = vector.broadcast %13 : vector<1x384xf32> to vector<16x384xf32>
    %15 = arith.mulf %12, %14 : vector<16x384xf32>
    %cst_9 = arith.constant dense<0.000000e+00> : vector<16xf32>
    %16 = vector.multi_reduction <add>, %15, %cst_9 [1] : vector<16x384xf32> to vector<16xf32>
    %17 = vector.shape_cast %16 : vector<16xf32> to vector<16x1xf32>
    %c0_10 = arith.constant 0 : index
    %18 = memref.load %arg6[%c0_10] : memref<1xf32, #tpu.memory_space<smem>>
    %19 = vector.broadcast %18 : f32 to vector<16x1xf32>
    %20 = arith.addf %17, %19 : vector<16x1xf32>
    %cst_11 = arith.constant 0.000000e+00 : f32
    %21 = vector.broadcast %cst_11 : f32 to vector<16x1xf32>
    %22 = arith.subf %21, %20 : vector<16x1xf32>
    %23 = math.exp %22 : vector<16x1xf32>
    %cst_12 = arith.constant 1.000000e+00 : f32
    %24 = vector.broadcast %cst_12 : f32 to vector<16x1xf32>
    %25 = arith.addf %24, %23 : vector<16x1xf32>
    %26 = tpu.reciprocal %25 {approx = true} : vector<16x1xf32> -> vector<16x1xf32>
    %c0_13 = arith.constant 0 : index
    %c0_14 = arith.constant 0 : index
    %27 = vector.load %arg7[%c0_13, %c0_14] : memref<16x1xf32, #tpu.memory_space<vmem>>, vector<16x1xf32>
    tpu.vector_store %arg7[%c0_13, %c0_14], %26 {strides = array<i32>} : memref<16x1xf32, #tpu.memory_space<vmem>>, vector<16x1xf32>,
    return
  }
  func.func @transform_0(%arg0: i32) -> (i32, i32) {
    %c0_i32 = arith.constant 0 : i32
    %c0_i32_0 = arith.constant 0 : i32
    return %arg0, %c0_i32 : i32, i32
  }
  func.func @transform_1(%arg0: i32) -> (i32, i32) {
    %c0_i32 = arith.constant 0 : i32
    %c0_i32_0 = arith.constant 0 : i32
    %c0_i32_1 = arith.constant 0 : i32
    return %c0_i32, %c0_i32_0 : i32, i32
  }
  func.func @transform_2(%arg0: i32) -> (i32, i32) {
    %c0_i32 = arith.constant 0 : i32
    %c0_i32_0 = arith.constant 0 : i32
    %c0_i32_1 = arith.constant 0 : i32
    return %c0_i32, %c0_i32_0 : i32, i32
  }
  func.func @transform_3(%arg0: i32) -> (i32, i32) {
    %c0_i32 = arith.constant 0 : i32
    %c0_i32_0 = arith.constant 0 : i32
    %c0_i32_1 = arith.constant 0 : i32
    return %c0_i32, %c0_i32_0 : i32, i32
  }
  func.func @transform_4(%arg0: i32) -> i32 {
    %c0_i32 = arith.constant 0 : i32
    %c0_i32_0 = arith.constant 0 : i32
    return %c0_i32 : i32
  }
  func.func @transform_5(%arg0: i32) -> i32 {
    %c0_i32 = arith.constant 0 : i32
    %c0_i32_0 = arith.constant 0 : i32
    return %c0_i32 : i32
  }
  func.func @transform_6(%arg0: i32) -> (i32, i32) {
    %c0_i32 = arith.constant 0 : i32
    %c0_i32_0 = arith.constant 0 : i32
    return %arg0, %c0_i32 : i32, i32
  }
}

</mosaic_0001>

<bundles_post_ra>
// kernel: tpu_custom_call.1
= control target key start
LH: loop header
LB: loop body
LE: loop exit
PB: predicated region body
PF: predicated region fallthrough
CT: control target
= control target key end

     0   :  { %13 = vsyncpa [#allocation5], 0  ;;  %s433_s0 = inlined_call_operand.hbm [shape: f32[16,32], index: 0, kind: input, shape index: {}]   ;;  %s434_s1 = inlined_call_operand.hbm [shape: bf16[32,384], index: 1, kind: input, shape index: {}]   ;;  %s435_s2 = inlined_call_operand.vmem [shape: f32[1,384], index: 2, kind: input, shape index: {}]   ;;  %s436_s3 = inlined_call_operand.vmem [shape: f32[1,384], index: 3, kind: input, shape index: {}]   ;;  %s437_s4 = inlined_call_operand.<no memory space> [shape: f32[1], index: 4, kind: input, shape index: {}]   ;;  %s438_s5 = inlined_call_operand.<no memory space> [shape: f32[1], index: 5, kind: input, shape index: {}]   ;;  %s439_s6 = inlined_call_operand.vmem [shape: f32[16,1], index: 6, kind: output, shape index: {}]  }
   0x1   :  { %14 = vsyncpa [#allocation7], 0  ;;  %s364_s21 = smov [#allocation4]  }
   0x2   :  { %s20_s22 = sshll.u32 %s364_s21, 4  ;;  %s21_s22 = int_to_ptr.vmem [resolvable:$true] %s20_s22 }
   0x3   :  { %s328_s23 = scalar_lea.vmem %s21_s22, 256  ;;  %p333_p1 = scmp.lt.s32.totalorder %s21_s22, %s21_s22 }
   0x4   :  { %p329_p0 = scmp.ne.s32.totalorder %s21_s22, %s328_s23  ;;  %p334_p2 = scmp.lt.s32.totalorder %s328_s23, %s328_s23 }
   0x6   :  { %p335_p3 = por %p334_p2, %p333_p1 }
   0x8   :  { %p336_p4 = pnand %p335_p3, %p329_p0 }
   0xa   :  { %339 = shalt.err (!%p336_p4)
}
   0xb   :  { %s365_s24 = smov 128   ;;  %s366_s25 = smov 8  }
   0xc   :  { %26 = dma.hbm_to_vmem [thread:$0]  %s433_s0, 256, %s21_s22, [#allocation5], %s365_s24, %s365_s24, %s366_s25  }
   0xd   :  { %s367_s28 = smov [#allocation6]  }
   0xe   :  { %s32_s29 = sshll.u32 %s367_s28, 4  ;;  %s33_s29 = int_to_ptr.vmem [resolvable:$true] %s32_s29 }
   0xf   :  { %s348_s30 = scalar_lea.vmem %s33_s29, 768  ;;  %p353_p6 = scmp.lt.s32.totalorder %s33_s29, %s33_s29 }
  0x10   :  { %p349_p5 = scmp.ne.s32.totalorder %s33_s29, %s348_s30  ;;  %p354_p7 = scmp.lt.s32.totalorder %s348_s30, %s348_s30 }
  0x12   :  { %p355_p8 = por %p354_p7, %p353_p6 }
  0x14   :  { %p356_p9 = pnand %p355_p8, %p349_p5 }
  0x16   :  { %359 = shalt.err (!%p356_p9)
}
  0x17   :  { %s368_s7 = smov 192   ;;  %s369_s8 = smov 12  }
  0x18   :  { %38 = dma.hbm_to_vmem [thread:$0]  %s434_s1, 768, %s33_s29, [#allocation7], %s368_s7, %s368_s7, %s369_s8  }
  0x19   :  { %360 = dma.done.wait [#allocation5], 256  }
  0x1a   :  { %361 = vsyncadd [#allocation5], 4294967040 }
  0x1b   :  { %362 = dma.done.wait [#allocation7], 768  }
  0x1c   :  { %363 = vsyncadd [#allocation7], 4294966528  ;;  %v370_v0 = vmov 0.0   ;;  %vm371_vm0 = vmmov 0   ;;  %v372_v1 = vmov 0   ;;  %v54_v8 = vld [vmem:[#allocation4] sm:$0xff]  ;;  %v67_v11 = vlaneseq }
  0x1d   :  { %287 = vmatprep.subr.bf16.mxu1 %v370_v0  ;;  %291 = vmatprep.mubr.msk.bf16.mxu1 %vm371_vm0, %v370_v0  ;;  %v304_v2 = vld [vmem:[#allocation6 + $0x1c] ss:$12 sps:$4 sm:$0xff]   ;;  %v306_v3 = vld [vmem:[#allocation6 + $0x20] ss:$12 sps:$4 sm:$0xff]   ;;  %v307_v4 = vld [vmem:[#allocation6 + $0x18] ss:$12 sps:$4 sm:$0xff]   ;;  %v209_v22 = vstv %s437_s4  ;;  %v254_v61 = vstv %s438_s5 }
  0x1e   :  { %150 = vmatprep.mubr.bf16.mxu0 %v372_v1  ;;  %130 = vmatprep.subr.bf16.mxu0 %v304_v2  ;;  %v308_v5 = vld [vmem:[#allocation6 + $0x4] ss:$12 sps:$4 sm:$0xff]   ;;  %v310_v6 = vld [vmem:[#allocation6 + $0x8] ss:$12 sps:$4 sm:$0xff]   ;;  %v311_v7 = vld [vmem:[#allocation6] ss:$12 sps:$4 sm:$0xff]  }
  0x1f   :  { %288 = vmatpush3.bf16.msra.mxu1 %v306_v3  ;;  %131 = vmatpush1.bf16.msra.mxu0 %v307_v4  ;;  %v55_v9 = vld [vmem:[#allocation4 + $0x8] sm:$0xff]  ;;  %vm114_vm1 = vcmask 261120   ;;  %v68_v12 = vshrl.u32 %v67_v11, 7  ;;  %v65_v15 = vld [vmem:[%s435_s2] sm:$0x7]  ;;  %vm267_vm8 = vcmask 7168  }
  0x20   :  { %289 = vmatprep.subr.bf16.mxu1 %v370_v0  ;;  %132 = vmatprep.subr.bf16.mxu0 %v308_v5  ;;  %v56_v10 = vpack.c.bf16 %v55_v9, %v54_v8  ;;  %v222_v26 = vld [vmem:[%s436_s3] sm:$0x7] }
  0x21   :  { %v77_v13 = vsub.s32 2, %v68_v12  ;;  %v69_v14 = vsub.s32 0, %v68_v12  ;;  %v73_v16 = vsub.s32 1, %v68_v12 }
  0x23   :  { %290 = vmatpush3.bf16.msra.mxu1 %v310_v6  ;;  %133 = vmatpush1.bf16.msra.mxu0 %v311_v7  ;;  %v78_v17 = vrot.slane %v65_v15, %v77_v13  ;;  %v70_v18 = vrot.slane %v65_v15, %v69_v14  ;;  %v74_v20 = vrot.slane %v65_v15, %v73_v16 }
  0x24   :  { %v227_v34 = vrot.slane %v222_v26, %v69_v14  ;;  %v231_v35 = vrot.slane %v222_v26, %v73_v16  ;;  %v235_v43 = vrot.slane %v222_v26, %v77_v13 }
  0x26   :  { %292 = vmatmul.mubr.msk.bf16.vlgmr.msra.gmra.mxu1 %vm114_vm1, %v56_v10  ;;  %282 = vmatmul.mubr.msk.bf16.vlgmr.msra.gmra.mxu0 %vm114_vm1, %v56_v10 }
  0xe6   :  { %v195_v19 = vpop.f32.mrf.mxu1  ;;  %v152_v23 = vpop.f32.mrf.mxu0 }
  0xe7   :  { %v196_v21 = vadd.f32 %v195_v19, %v78_v17  ;;  %v153_v24 = vadd.f32 %v152_v23, %v70_v18 }
  0xe8   :  { %v293_v25 = vpop.f32.mrf.mxu1  ;;  %v154_v28 = vpop.f32.mrf.mxu0 }
  0xe9   :  { %v212_v27 = vmul.f32 %v209_v22, %v196_v21  ;;  %vm205_vm2 = vcmp.ge.f32.partialorder %v196_v21, 0.0  ;;  %vm203_vm3 = vcmp.ge.f32.partialorder %v153_v24, 0.0  ;;  %v210_v29 = vmul.f32 %v209_v22, %v153_v24 }
  0xea   :  { %v155_v30 = vadd.f32 %v154_v28, %v74_v20  ;;  %v198_v31 = vpop.f32.mrf.mxu1  ;;  %v156_v33 = vpop.f32.mrf.mxu0 }
  0xeb   :  { %v199_v32 = vadd.f32 %v198_v31, %v78_v17  ;;  %v157_v37 = vadd.f32 %v156_v33, %v70_v18  ;;  %v216_v39 = vsel %vm203_vm3, %v153_v24, %v210_v29  ;;  %v218_v42 = vsel %vm205_vm2, %v196_v21, %v212_v27 }
  0xec   :  { %vm204_vm4 = vcmp.ge.f32.partialorder %v155_v30, 0.0  ;;  %v211_v36 = vmul.f32 %v209_v22, %v155_v30  ;;  %v294_v38 = vpop.f32.mrf.mxu1  ;;  %v158_v41 = vpop.f32.mrf.mxu0  ;;  %v239_v47 = vmul.f32 %v227_v34, %v216_v39  ;;  %v241_v51 = vmul.f32 %v235_v43, %v218_v42 }
  0xed   :  { %v215_v40 = vmul.f32 %v209_v22, %v199_v32  ;;  %vm206_vm5 = vcmp.ge.f32.partialorder %v157_v37, 0.0  ;;  %v213_v44 = vmul.f32 %v209_v22, %v157_v37  ;;  %v159_v45 = vadd.f32 %v158_v41, %v74_v20 }
  0xee   :  { %v217_v46 = vsel %vm204_vm4, %v155_v30, %v211_v36  ;;  %vm208_vm6 = vcmp.ge.f32.partialorder %v199_v32, 0.0 }
  0xef   :  { %v240_v48 = vmul.f32 %v231_v35, %v217_v46  ;;  %v219_v49 = vsel %vm206_vm5, %v157_v37, %v213_v44  ;;  %vm207_vm7 = vcmp.ge.f32.partialorder %v159_v45, 0.0  ;;  %v214_v50 = vmul.f32 %v209_v22, %v159_v45 }
  0xf0   :  { %v221_v54 = vsel %vm208_vm6, %v199_v32, %v215_v40  ;;  %v242_v56 = vmul.f32 %v227_v34, %v219_v49 }
  0xf1   :  { %v245_v52 = vadd.f32 %v240_v48, %v239_v47  ;;  %v220_v53 = vsel %vm207_vm7, %v159_v45, %v214_v50  ;;  %v244_v58 = vmul.f32 %v235_v43, %v221_v54 }
  0xf2   :  { %v243_v57 = vmul.f32 %v231_v35, %v220_v53 }
  0xf3   :  { %v246_v55 = vadd.f32 %v245_v52, %v241_v51 }
  0xf4   :  { %v249_v59 = vadd.f32 %v243_v57, %v242_v56 }
  0xf5   :  { %247 = vadd.xlane.f32.xlu0 %v246_v55 }
  0xf6   :  { %v250_v60 = vadd.f32 %v249_v59, %v244_v58 }
  0xf9   :  { %251 = vadd.xlane.f32.xlu0 %v250_v60 }
 0x17e   :  { %v248_v62 = vpop.xlane.xlu0 %247 }
 0x17f   :  { %v255_v63 = vadd.f32 %v254_v61, %v248_v62 }
 0x181   :  { %v257_v0 = vsub.f32 0.0, %v255_v63 }
 0x182   :  { %v252_v1 = vpop.xlane.xlu0 %251 }
 0x183   :  { %v259_v2 = vmul.f32 1.442695, %v257_v0  ;;  %v256_v3 = vadd.f32 %v254_v61, %v252_v1 }
 0x185   :  { %312 = vpow2.f32 %v259_v2  ;;  %v258_v4 = vsub.f32 0.0, %v256_v3 }
 0x187   :  { %v261_v5 = vmul.f32 1.442695, %v258_v4 }
 0x189   :  { %314 = vpow2.f32 %v261_v5 }
 0x192   :  { %v313_v6 = vpop.eup %312 }
 0x193   :  { %v263_v7 = vadd.f32 1.0, %v313_v6 }
 0x195   :  { %316 = vrcp.f32 %v263_v7 }
 0x196   :  { %v315_v8 = vpop.eup %314 }
 0x197   :  { %v264_v9 = vadd.f32 1.0, %v315_v8 }
 0x199   :  { %318 = vrcp.f32 %v264_v9 }
 0x1a2   :  { %v317_v10 = vpop.eup %316 }
 0x1a3   :  { %268 = vst.msk [vmem:[%s439_s6] sm:$0xff] %vm267_vm8, %v317_v10 }
 0x1a6   :  { %v319_v11 = vpop.eup %318 }
 0x1a7   :  { %269 = vst.msk [vmem:[%s439_s6 + $0x8] sm:$0xff] %vm267_vm8, %v319_v11 }
 0x1a8   :  { %274 = vsyncpa [#allocation5], 1 }
 0x1a9   :  { %275 = vsyncpa [#allocation7], 1 }

</bundles_post_ra>
